<compile_context>
chip_gen: v6e
topology: v6e:2x2x1
jax: 0.10.0
libtpu: 0.0.40
codegen_flags: <defaults>
</compile_context>

<pallas_src>
import jax
import jax.numpy as jnp
from jax.experimental import pallas as pl
from jax.experimental.pallas import tpu as pltpu

_SUBLANE = 8


def _round_up(x, m):
    return ((x + m - 1) // m) * m


def _mlp_kernel(x_ref, w1_ref, b1_ref, w2_ref, b2_ref, w3_ref, b3_ref, o_ref):
    # fc1 + ReLU
    h = jnp.dot(x_ref[...], w1_ref[...], preferred_element_type=jnp.float32)
    h = jnp.maximum(h + b1_ref[...], 0.0)
    # fc2 + ReLU
    h = jnp.dot(h, w2_ref[...], preferred_element_type=jnp.float32)
    h = jnp.maximum(h + b2_ref[...], 0.0)
    # fc3 (no activation)
    out = jnp.dot(h, w3_ref[...], preferred_element_type=jnp.float32)
    o_ref[...] = (out + b3_ref[...]).astype(o_ref.dtype)


def reseau_profond_forward(x, w1, b1, w2, b2, w3, b3, *, tm=2048):
    """Pallas TPU forward for ReseauProfond.

    x:  (N, d)   float32
    w1: (d, h1)  b1: (1, h1)
    w2: (h1, h2) b2: (1, h2)
    w3: (h2, k)  b3: (1, k)
    returns (N, k) float32
    """
    N, d = x.shape
    h1 = w1.shape[1]
    h2 = w2.shape[1]
    k = w3.shape[1]

    # Row tile: multiple of 8 sublanes.  Cap so the grid has >= 4 steps when N
    # allows it (>= 2 steps per TensorCore on v7x), while never exceeding `tm`.
    tm = max(_SUBLANE, (tm // _SUBLANE) * _SUBLANE)
    TM = min(tm, _round_up(pl.cdiv(N, 4), _SUBLANE))
    grid = (pl.cdiv(N, TM),)

    # Weights/biases: full-array blocks with constant index_map -> VMEM-resident
    # across all grid steps (no per-step reload).
    def resident(a):
        nd = a.ndim
        return pl.BlockSpec(a.shape, lambda i, _nd=nd: (0,) * _nd)

    # VMEM budget: resident weights (double-buffered by default) + streamed
    # in/out tiles (double-buffered) + live f32 activations; 2x safety margin,
    # floor 16 MiB, cap 48 MiB (stays under v7x's 64 MiB physical VMEM).
    weight_bytes = 4 * (d * h1 + h1 * h2 + h2 * k + h1 + h2 + k)
    stream_bytes = 4 * 2 * TM * (d + k)
    act_bytes = 4 * TM * (h1 + h2)
    vmem_limit = min(max(2 * (2 * weight_bytes + stream_bytes + act_bytes), 16 << 20),
                     48 << 20)

    out = pl.pallas_call(
        _mlp_kernel,
        out_shape=jax.ShapeDtypeStruct((N, k), jnp.float32),
        grid=grid,
        in_specs=[pl.BlockSpec((TM, d), lambda i: (i, 0)),
                  resident(w1), resident(b1),
                  resident(w2), resident(b2),
                  resident(w3), resident(b3)],
        out_specs=pl.BlockSpec((TM, k), lambda i: (i, 0)),
        compiler_params=pltpu.CompilerParams(
            dimension_semantics=("parallel",),
            vmem_limit_bytes=vmem_limit),
    )(x, w1, b1, w2, b2, w3, b3)

    return out


def init_params(key, d, h1, h2, k):
    """Deterministic init mimicking nn.Linear's uniform(-1/sqrt(fan_in), +1/sqrt(fan_in)).

    Weights are returned already transposed to (in, out) layout so y = x @ W + b."""
    ks = jax.random.split(key, 6)

    def lin(kw, kb, fan_in, fan_out):
        bound = 1.0 / jnp.sqrt(fan_in)
        w = jax.random.uniform(kw, (fan_in, fan_out), jnp.float32, -bound, bound)
        b = jax.random.uniform(kb, (1, fan_out), jnp.float32, -bound, bound)
        return w, b

    w1, b1 = lin(ks[0], ks[1], d, h1)
    w2, b2 = lin(ks[2], ks[3], h1, h2)
    w3, b3 = lin(ks[4], ks[5], h2, k)
    return w1, b1, w2, b2, w3, b3


def reference_forward(x, w1, b1, w2, b2, w3, b3):
    h = jnp.maximum(x @ w1 + b1, 0.0)
    h = jnp.maximum(h @ w2 + b2, 0.0)
    return h @ w3 + b3


if __name__ == "__main__":
    key = jax.random.PRNGKey(0)
    kx, kx2, kp = jax.random.split(key, 3)

    # Small shapes consistent with the module: d=32, h1=64, h2=32, k=8.
    d, h1, h2, k = 32, 64, 32, 8
    params = init_params(kp, d, h1, h2, k)

    # Case 1: tiny batch (TM capped to a few sublanes, 2-step grid).
    N1 = 16
    x1 = jax.random.normal(kx, (N1, d), dtype=jnp.float32)
    out1 = jax.block_until_ready(reseau_profond_forward(x1, *params))
    ref1 = reference_forward(x1, *params)
    assert out1.shape == (N1, k)
    assert jnp.allclose(out1, ref1, atol=1e-5, rtol=1e-5)

    # Case 2: batch not divisible by the tile -> exercises the cdiv grid and
    # the masked boundary block (no row padding anywhere).
    N2 = 300
    x2 = jax.random.normal(kx2, (N2, d), dtype=jnp.float32)
    out2 = jax.block_until_ready(reseau_profond_forward(x2, *params, tm=256))
    ref2 = reference_forward(x2, *params)
    assert out2.shape == (N2, k)
    assert jnp.allclose(out2, ref2, atol=1e-5, rtol=1e-5)

    # Case 3: default tm=2048 path on a slightly larger (still small) batch.
    N3 = 1000
    x3 = jax.random.normal(kx, (N3, d), dtype=jnp.float32)
    out3 = jax.block_until_ready(reseau_profond_forward(x3, *params))
    ref3 = reference_forward(x3, *params)
    assert out3.shape == (N3, k)
    assert jnp.allclose(out3, ref3, atol=1e-5, rtol=1e-5)

    print("KERNEL_OK")
</pallas_src>

<mosaic_0001>
module attributes {stable_mosaic.version = 11 : i64} {
  func.func @_mlp_kernel(%arg0: i32, %arg1: memref<8x32xf32, #tpu.memory_space<vmem>>, %arg2: memref<32x64xf32, #tpu.memory_space<vmem>>, %arg3: memref<1x64xf32, #tpu.memory_space<vmem>>, %arg4: memref<64x32xf32, #tpu.memory_space<vmem>>, %arg5: memref<1x32xf32, #tpu.memory_space<vmem>>, %arg6: memref<32x8xf32, #tpu.memory_space<vmem>>, %arg7: memref<1x8xf32, #tpu.memory_space<vmem>>, %arg8: memref<8x8xf32, #tpu.memory_space<vmem>>) attributes {dimension_semantics = [#tpu.dimension_semantics<parallel>], iteration_bounds = array<i64: 2>, scalar_prefetch = 0 : i64, scratch_operands = 0 : i64, tpu.core_type = #tpu.core_type<tc>, window_params = [{transform_indices = @transform_0, window_bounds = array<i64: 8, 32>}, {pipeline_mode = #tpu.pipeline_mode<synchronous>, transform_indices = @transform_1, window_bounds = array<i64: 32, 64>}, {pipeline_mode = #tpu.pipeline_mode<synchronous>, transform_indices = @transform_2, window_bounds = array<i64: 1, 64>}, {pipeline_mode = #tpu.pipeline_mode<synchronous>, transform_indices = @transform_3, window_bounds = array<i64: 64, 32>}, {pipeline_mode = #tpu.pipeline_mode<synchronous>, transform_indices = @transform_4, window_bounds = array<i64: 1, 32>}, {pipeline_mode = #tpu.pipeline_mode<synchronous>, transform_indices = @transform_5, window_bounds = array<i64: 32, 8>}, {pipeline_mode = #tpu.pipeline_mode<synchronous>, transform_indices = @transform_6, window_bounds = array<i64: 1, 8>}, {transform_indices = @transform_7, window_bounds = array<i64: 8, 8>}]} {
    %c0 = arith.constant 0 : index
    %c0_0 = arith.constant 0 : index
    %0 = vector.load %arg1[%c0, %c0_0] : memref<8x32xf32, #tpu.memory_space<vmem>>, vector<8x32xf32>
    %c0_1 = arith.constant 0 : index
    %c0_2 = arith.constant 0 : index
    %1 = vector.load %arg2[%c0_1, %c0_2] : memref<32x64xf32, #tpu.memory_space<vmem>>, vector<32x64xf32>
    %cst = arith.constant dense<0.000000e+00> : vector<8x64xf32>
    %2 = tpu.matmul %0, %1, %cst {dimension_numbers = #tpu.dot_dimension_numbers<[1], [0], [0], [1], [0, 0, 1, 1], [], []>} : vector<8x32xf32>, vector<32x64xf32>, vector<8x64xf32> -> vector<8x64xf32>
    %c0_3 = arith.constant 0 : index
    %c0_4 = arith.constant 0 : index
    %3 = vector.load %arg3[%c0_3, %c0_4] : memref<1x64xf32, #tpu.memory_space<vmem>>, vector<1x64xf32>
    %4 = vector.broadcast %3 : vector<1x64xf32> to vector<8x64xf32>
    %5 = arith.addf %2, %4 : vector<8x64xf32>
    %cst_5 = arith.constant 0.000000e+00 : f32
    %6 = vector.broadcast %cst_5 : f32 to vector<8x64xf32>
    %7 = arith.maximumf %5, %6 : vector<8x64xf32>
    %c0_6 = arith.constant 0 : index
    %c0_7 = arith.constant 0 : index
    %8 = vector.load %arg4[%c0_6, %c0_7] : memref<64x32xf32, #tpu.memory_space<vmem>>, vector<64x32xf32>
    %cst_8 = arith.constant dense<0.000000e+00> : vector<8x32xf32>
    %9 = tpu.matmul %7, %8, %cst_8 {dimension_numbers = #tpu.dot_dimension_numbers<[1], [0], [0], [1], [0, 0, 1, 1], [], []>} : vector<8x64xf32>, vector<64x32xf32>, vector<8x32xf32> -> vector<8x32xf32>
    %c0_9 = arith.constant 0 : index
    %c0_10 = arith.constant 0 : index
    %10 = vector.load %arg5[%c0_9, %c0_10] : memref<1x32xf32, #tpu.memory_space<vmem>>, vector<1x32xf32>
    %11 = vector.broadcast %10 : vector<1x32xf32> to vector<8x32xf32>
    %12 = arith.addf %9, %11 : vector<8x32xf32>
    %cst_11 = arith.constant 0.000000e+00 : f32
    %13 = vector.broadcast %cst_11 : f32 to vector<8x32xf32>
    %14 = arith.maximumf %12, %13 : vector<8x32xf32>
    %c0_12 = arith.constant 0 : index
    %c0_13 = arith.constant 0 : index
    %15 = vector.load %arg6[%c0_12, %c0_13] : memref<32x8xf32, #tpu.memory_space<vmem>>, vector<32x8xf32>
    %cst_14 = arith.constant dense<0.000000e+00> : vector<8x8xf32>
    %16 = tpu.matmul %14, %15, %cst_14 {dimension_numbers = #tpu.dot_dimension_numbers<[1], [0], [0], [1], [0, 0, 1, 1], [], []>} : vector<8x32xf32>, vector<32x8xf32>, vector<8x8xf32> -> vector<8x8xf32>
    %c0_15 = arith.constant 0 : index
    %c0_16 = arith.constant 0 : index
    %17 = vector.load %arg7[%c0_15, %c0_16] : memref<1x8xf32, #tpu.memory_space<vmem>>, vector<1x8xf32>
    %18 = vector.broadcast %17 : vector<1x8xf32> to vector<8x8xf32>
    %19 = arith.addf %16, %18 : vector<8x8xf32>
    %c0_17 = arith.constant 0 : index
    %c0_18 = arith.constant 0 : index
    %20 = vector.load %arg8[%c0_17, %c0_18] : memref<8x8xf32, #tpu.memory_space<vmem>>, vector<8x8xf32>
    tpu.vector_store %arg8[%c0_17, %c0_18], %19 {strides = array<i32>} : memref<8x8xf32, #tpu.memory_space<vmem>>, vector<8x8xf32>,
    return
  }
  func.func @transform_0(%arg0: i32) -> (i32, i32) {
    %c0_i32 = arith.constant 0 : i32
    %c0_i32_0 = arith.constant 0 : i32
    return %arg0, %c0_i32 : i32, i32
  }
  func.func @transform_1(%arg0: i32) -> (i32, i32) {
    %c0_i32 = arith.constant 0 : i32
    %c0_i32_0 = arith.constant 0 : i32
    %c0_i32_1 = arith.constant 0 : i32
    return %c0_i32, %c0_i32_0 : i32, i32
  }
  func.func @transform_2(%arg0: i32) -> (i32, i32) {
    %c0_i32 = arith.constant 0 : i32
    %c0_i32_0 = arith.constant 0 : i32
    %c0_i32_1 = arith.constant 0 : i32
    return %c0_i32, %c0_i32_0 : i32, i32
  }
  func.func @transform_3(%arg0: i32) -> (i32, i32) {
    %c0_i32 = arith.constant 0 : i32
    %c0_i32_0 = arith.constant 0 : i32
    %c0_i32_1 = arith.constant 0 : i32
    return %c0_i32, %c0_i32_0 : i32, i32
  }
  func.func @transform_4(%arg0: i32) -> (i32, i32) {
    %c0_i32 = arith.constant 0 : i32
    %c0_i32_0 = arith.constant 0 : i32
    %c0_i32_1 = arith.constant 0 : i32
    return %c0_i32, %c0_i32_0 : i32, i32
  }
  func.func @transform_5(%arg0: i32) -> (i32, i32) {
    %c0_i32 = arith.constant 0 : i32
    %c0_i32_0 = arith.constant 0 : i32
    %c0_i32_1 = arith.constant 0 : i32
    return %c0_i32, %c0_i32_0 : i32, i32
  }
  func.func @transform_6(%arg0: i32) -> (i32, i32) {
    %c0_i32 = arith.constant 0 : i32
    %c0_i32_0 = arith.constant 0 : i32
    %c0_i32_1 = arith.constant 0 : i32
    return %c0_i32, %c0_i32_0 : i32, i32
  }
  func.func @transform_7(%arg0: i32) -> (i32, i32) {
    %c0_i32 = arith.constant 0 : i32
    %c0_i32_0 = arith.constant 0 : i32
    return %arg0, %c0_i32 : i32, i32
  }
}

</mosaic_0001>

<bundles_post_ra>
// kernel: tpu_custom_call.1
= control target key start
LH: loop header
LB: loop body
LE: loop exit
PB: predicated region body
PF: predicated region fallthrough
CT: control target
= control target key end

     0   :  { %s725_s24 = smov 0   ;;  %s811_s0 = inlined_call_operand.vmem [shape: f32[16,32], index: 0, kind: input, shape index: {}]   ;;  %s812_s1 = inlined_call_operand.vmem [shape: f32[32,64], index: 1, kind: input, shape index: {}]   ;;  %s813_s2 = inlined_call_operand.vmem [shape: f32[1,64], index: 2, kind: input, shape index: {}]   ;;  %s814_s3 = inlined_call_operand.vmem [shape: f32[64,32], index: 3, kind: input, shape index: {}]   ;;  %s815_s4 = inlined_call_operand.vmem [shape: f32[1,32], index: 4, kind: input, shape index: {}]   ;;  %s816_s5 = inlined_call_operand.vmem [shape: f32[32,8], index: 5, kind: input, shape index: {}]   ;;  %s817_s6 = inlined_call_operand.vmem [shape: f32[1,8], index: 6, kind: input, shape index: {}]   ;;  %s818_s7 = inlined_call_operand.vmem [shape: f32[16,8], index: 7, kind: output, shape index: {}]  }
   0x1 LB: > { %s590_s25 = sadd.s32 4294967295, %s681_s24   ;;  %p594_p0 = scmp.ge.s32.totalorder %s681_s24, 1  ;;  %s681_s24 = sphi %s725_s24, %s17_s24  }
   0x2   : > { %p236_p1 = scmp.lt.s32.totalorder %s681_s24, 3 }
   0x4   : > { %p237_p2 = pnand %p594_p0, %p236_p1 }
   0x5   : > { %p266_p3 = scmp.lt.s32.totalorder (!%p237_p2), %s590_s25, 1 }
   0x6   : > { %240 = sbr.rel (%p237_p2) target bundleno = 610 (0x262), region = 48 }
   0xb   : > { %v278_v0 = vld [vmem:[%s812_s1 + $0x18] sm:$0xff]  ;;  %v683_v1 = vmov 0.0   ;;  %v277_v2 = vld [vmem:[%s812_s1 + $0x10] sm:$0xff]  ;;  %vm684_vm0 = vmmov 0   ;;  %s820_s25 = smov (!%p266_p3, %s590_s25), 1  ;;  %v276_v5 = vld [vmem:[%s812_s1 + $0x8] sm:$0xff] }
   0xc   : > { %624 = vmatprep.subr.mxu0 %v683_v1  ;;  %632 = vmatprep.mubr.msk.f32.mxu0 %vm684_vm0, %v683_v1  ;;  %v368_v3 = vld [vmem:[%s814_s3 + $0x38] sm:$0xff]  ;;  %v367_v4 = vld [vmem:[%s814_s3 + $0x30] sm:$0xff]  ;;  %s595_s13 = sshll.u32 %s820_s25, 3  ;;  %v366_v6 = vld [vmem:[%s814_s3 + $0x28] sm:$0xff]  ;;  %vm286_vm1 = vcmask 261120   ;;  %vm376_vm2 = vcmask 523264  }
   0xd   : > { %625 = vmatpush3.msra.mxu0 %v278_v0  ;;  %635 = vmatprep.subr.mxu1 %v683_v1  ;;  %v275_v7 = vld [vmem:[%s812_s1] sm:$0xff]  ;;  %s269_s20 = scalar_lea.vmem %s811_s0, %s595_s13  ;;  %v364_v10 = vld [vmem:[%s814_s3 + $0x18] sm:$0xff]  ;;  %v363_v11 = vld [vmem:[%s814_s3 + $0x10] sm:$0xff]  ;;  %s273_s29 = scalar_lea.vmem %s818_s7, %s595_s13  ;;  %vm535_vm3 = vcmask 64512  }
   0xe   : > { %626 = vmatprep.subr.mxu0 %v683_v1  ;;  %636 = vmatpush3.msra.mxu1 %v368_v3  ;;  %v274_v8 = vld [vmem:[%s269_s20] sm:$0xff]  ;;  %v362_v12 = vld [vmem:[%s814_s3 + $0x8] sm:$0xff]  ;;  %v454_v14 = vld [vmem:[%s816_s5 + $0x18] sm:$0xff] }
   0xf   : > { %627 = vmatpush3.msra.mxu0 %v277_v2  ;;  %637 = vmatprep.subr.mxu1 %v683_v1  ;;  %v365_v9 = vld [vmem:[%s814_s3 + $0x20] sm:$0xff]  ;;  %v453_v20 = vld [vmem:[%s816_s5 + $0x10] sm:$0xff]  ;;  %v452_v21 = vld [vmem:[%s816_s5 + $0x8] sm:$0xff] }
  0x10   : > { %628 = vmatprep.subr.mxu0 %v683_v1  ;;  %638 = vmatpush3.msra.mxu1 %v367_v4  ;;  %v361_v13 = vld [vmem:[%s814_s3] sm:$0xff] }
  0x11   : > { %629 = vmatpush3.msra.mxu0 %v276_v5  ;;  %639 = vmatprep.subr.mxu1 %v683_v1  ;;  %v597_v15 = vld [vmem:[%s813_s2] ss:$0 sm:$0xff] }
  0x12   : > { %630 = vmatprep.subr.mxu0 %v683_v1  ;;  %640 = vmatpush3.msra.mxu1 %v366_v6  ;;  %v451_v22 = vld [vmem:[%s816_s5] sm:$0xff] }
  0x13   : > { %631 = vmatpush3.msra.mxu0 %v275_v7  ;;  %641 = vmatprep.subr.mxu1 %v683_v1  ;;  %v599_v23 = vld [vmem:[%s815_s4] ss:$0 sm:$0xff] }
  0x14   : > { %633 = vmatmul.mubr.msk.f32.vlgmr.msra.gmra.mxu0 %vm286_vm1, %v274_v8  ;;  %642 = vmatpush3.msra.mxu1 %v365_v9  ;;  %v601_v28 = vld [vmem:[%s817_s6] ss:$0 sm:$0xff] }
  0x15   : > { %643 = vmatprep.subr.mxu1 %v683_v1  ;;  %651 = vmatprep.mubr.msk.f32.mxu1 %vm684_vm0, %v683_v1 }
  0x16   : > { %644 = vmatpush3.msra.mxu1 %v364_v10  ;;  %654 = vmatprep.subr.mxu0 %v683_v1 }
  0x17   : > { %645 = vmatprep.subr.mxu1 %v683_v1  ;;  %662 = vmatprep.mubr.msk.f32.mxu0 %vm684_vm0, %v683_v1 }
  0x18   : > { %646 = vmatpush3.msra.mxu1 %v363_v11  ;;  %655 = vmatpush3.msra.mxu0 %v454_v14 }
  0x19   : > { %647 = vmatprep.subr.mxu1 %v683_v1  ;;  %656 = vmatprep.subr.mxu0 %v683_v1 }
  0x1a   : > { %648 = vmatpush3.msra.mxu1 %v362_v12  ;;  %657 = vmatpush3.msra.mxu0 %v453_v20 }
  0x1b   : > { %649 = vmatprep.subr.mxu1 %v683_v1  ;;  %658 = vmatprep.subr.mxu0 %v683_v1 }
  0x1c   : > { %650 = vmatpush3.msra.mxu1 %v361_v13  ;;  %659 = vmatpush3.msra.mxu0 %v452_v21 }
  0x1d   : > { %660 = vmatprep.subr.mxu0 %v683_v1 }
  0x1e   : > { %661 = vmatpush3.msra.mxu0 %v451_v22 }
  0xd4   : > { %v356_v16 = vpop.f32.mrf.mxu0 }
  0xd5   : > { %v357_v17 = vadd.f32 %v597_v15, %v356_v16 }
  0xd6   : > { %v634_v18 = vpop.f32.mrf.mxu0 }
  0xd7   : > { %v360_v19 = vmax.f32 %v357_v17, 0.0 }
  0xd9   : > { %652 = vmatmul.mubr.msk.f32.vlgmr.msra.gmra.mxu1 %vm376_vm2, %v360_v19 }
 0x199   : > { %v446_v24 = vpop.f32.mrf.mxu1 }
 0x19a   : > { %v447_v25 = vadd.f32 %v599_v23, %v446_v24 }
 0x19b   : > { %v653_v26 = vpop.f32.mrf.mxu1 }
 0x19c   : > { %v450_v27 = vmax.f32 %v447_v25, 0.0 }
 0x19e   : > { %663 = vmatmul.mubr.msk.f32.vlgmr.msra.gmra.mxu0 %vm286_vm1, %v450_v27 }
 0x25e   : > { %v531_v29 = vpop.f32.mrf.mxu0 }
 0x25f   : > { %v532_v30 = vadd.f32 %v601_v28, %v531_v29 }
 0x260   : > { %v664_v31 = vpop.f32.mrf.mxu0 }
 0x261   : > { %536 = vst.msk [vmem:[%s273_s29] sm:$0xff] %vm535_vm3, %v532_v30 }
 0x262 PF: > { %s17_s24 = sadd.s32 1, %s681_s24  }
 0x263   : > { %p14_p4 = scmp.ge.s32.totalorder %s17_s24, 4  }
 0x265   :  { %16 = sbr.rel (!%p14_p4) target bundleno = 1 (0x1), region = 78 }

</bundles_post_ra>
